<compile_context>
chip_gen: v6e
topology: v6e:2x2x1
jax: 0.10.0
libtpu: 0.0.40
codegen_flags: <defaults>
</compile_context>

<pallas_src>
import math

import jax
import jax.numpy as jnp
from jax import lax
from jax.experimental import pallas as pl
from jax.experimental.pallas import tpu as pltpu


# --------------------------------------------------------------------------- #
# Kernels
# --------------------------------------------------------------------------- #
def _fused_affine_kernel(x_ref, w_ref, b_ref, out_ref):
    """Single-K-block case: out = x @ W_neg + b_final  (no scratch, no pl.when)."""
    x = x_ref[...].astype(w_ref.dtype)          # in-kernel cast (f32 -> bf16 if needed)
    acc = jnp.dot(x, w_ref[...], preferred_element_type=jnp.float32)
    out_ref[...] = (acc + b_ref[...]).astype(out_ref.dtype)


def _fused_affine_ktiled_kernel(x_ref, w_ref, b_ref, out_ref, acc_ref):
    """K-tiled fallback for very large D: f32 accumulator, k is the last grid axis."""
    k = pl.program_id(2)

    @pl.when(k == 0)
    def _init():
        acc_ref[...] = jnp.zeros_like(acc_ref)

    x = x_ref[...].astype(w_ref.dtype)
    acc_ref[...] += jnp.dot(x, w_ref[...], preferred_element_type=jnp.float32)

    @pl.when(k == pl.num_programs(2) - 1)
    def _finalize():
        out_ref[...] = (acc_ref[...] + b_ref[...]).astype(out_ref.dtype)


# --------------------------------------------------------------------------- #
# Helpers
# --------------------------------------------------------------------------- #
def _round_up(x, m):
    return (x + m - 1) // m * m


def _tpu_vmem_capacity_bytes():
    """Per-core VMEM capacity; conservative fallback if the query is unavailable."""
    try:
        return int(pltpu.get_tpu_info().vmem_capacity_bytes)
    except Exception:
        return 128 << 20


def _plan_tiles(batch, d, cp, w_itemsize):
    """Choose (TM, TK, TN), padded batch Bp / feature Dp and VMEM numbers."""
    vmem_cap = _tpu_vmem_capacity_bytes()
    small_vmem = vmem_cap <= (64 << 20)            # v7x-class: 64 MiB VMEM, 2 TCs
    budget = (28 << 20) if small_vmem else (40 << 20)

    # N tile: keep the output exactly Cp lanes wide unless classes are large.
    if cp <= 512:
        tn = cp
    elif cp % 256 == 0:
        tn = 256
    else:
        tn = 128

    sub = 8
    bp0 = _round_up(max(batch, sub), sub)

    tm_cap = min(bp0, 1024)
    if small_vmem and bp0 >= 2 * sub:
        # v7x-class: guarantee >= 2 batch tiles so both TensorCores are used.
        tm_cap = min(tm_cap, max(sub, (bp0 // 2) // sub * sub))

    def need_single(tm):
        return (2 * tm * d * 4                     # x tile (f32 in HBM), double-buffered
                + 2 * d * tn * w_itemsize          # weight tile, double-buffered
                + 2 * tm * tn * 4                  # output tile, double-buffered
                + 2 * 8 * tn * 4)                  # bias row (sublane-padded)

    def need_tiled(tm, tk):
        return (2 * tm * tk * 4
                + 2 * tk * tn * w_itemsize
                + 2 * tm * tn * 4
                + tm * tn * 4                      # f32 accumulator scratch
                + 2 * 8 * tn * 4)

    # Preferred path: whole D in a single K block (no scratch, no x padding on D).
    tm = tm_cap
    while tm > sub and need_single(tm) > budget:
        tm = max(sub, (tm // 2) // sub * sub)
    if need_single(tm) <= budget:
        return dict(tm=tm, tk=d, tn=tn, bp=_round_up(bp0, tm), dp=d,
                    k_tiled=False, need=need_single(tm), small_vmem=small_vmem)

    # Fallback: K-tiled reduction (very large D).
    dp = d if d % 128 == 0 else _round_up(d, 128)
    units = dp // 128
    tm = tm_cap
    tk = None
    while True:
        for u in range(units, 0, -1):
            if units % u == 0 and need_tiled(tm, 128 * u) <= budget:
                tk = 128 * u
                break
        if tk is not None or tm <= sub:
            break
        tm = max(sub, (tm // 2) // sub * sub)
    if tk is None:
        tk = 128  # last resort; vmem_limit below is derived from the real need
    return dict(tm=tm, tk=tk, tn=tn, bp=_round_up(bp0, tm), dp=dp,
                k_tiled=True, need=need_tiled(tm, tk), small_vmem=small_vmem)


# --------------------------------------------------------------------------- #
# One-time frozen-parameter preparation (hoisted out of the per-call path)
# --------------------------------------------------------------------------- #
def prepare_frozen_params(w_fc, b_fc, w_lin, *, weight_dtype=jnp.bfloat16):
    """Fold the frozen fc and the surrogate linear into `x @ W_neg + b_final`.

    w_fc : (C, D)  PyTorch (out, in) layout       b_fc : (C,)
    w_lin: (C, C)  PyTorch (out, in), bias-free

    Returns:
      w_neg   : (D, Cp)  = -(Wfc^T @ Wlin^T), zero-padded to Cp (mult. of 128),
                cast to `weight_dtype` (bf16 default -> half the HBM weight stream)
      b_final : (1, Cp) f32 = 1 - b_fc @ Wlin^T, zero-padded
    so that  1 - (x @ Wfc^T + b) @ Wlin^T == x @ W_neg + b_final.
    Call this ONCE (parameters are frozen) and reuse the result every forward.
    """
    C, _D = w_fc.shape
    w_fc32 = w_fc.astype(jnp.float32)
    w_lin32 = w_lin.astype(jnp.float32)
    # W_comb[d, c_out] = sum_c w_fc[c, d] * w_lin[c_out, c]   (no transposes materialized)
    w_comb = lax.dot_general(w_fc32, w_lin32,
                             dimension_numbers=(((0,), (1,)), ((), ())))      # (D, C)
    b_comb = lax.dot_general(b_fc.astype(jnp.float32)[None, :], w_lin32,
                             dimension_numbers=(((1,), (1,)), ((), ())))      # (1, C)
    cp = _round_up(max(C, 128), 128)
    w_neg = jnp.pad(-w_comb, ((0, 0), (0, cp - C))).astype(weight_dtype)      # (D, Cp)
    b_final = jnp.pad(1.0 - b_comb, ((0, 0), (0, cp - C)))                    # (1, Cp) f32
    return w_neg, b_final


# --------------------------------------------------------------------------- #
# Forward wrapper
# --------------------------------------------------------------------------- #
def surrogate_cp_forward(x_nchw, w_neg, b_final, *, num_classes):
    """
    x_nchw  : (B, C_in, H, W) float32  -- same layout as the PyTorch module input
    w_neg   : (D, Cp)  precomputed by prepare_frozen_params (frozen)
    b_final : (1, Cp)  precomputed by prepare_frozen_params (frozen, f32)
    returns : (B, num_classes) float32 == 1 - linear(base_model(x))
    """
    B = x_nchw.shape[0]
    D = int(math.prod(x_nchw.shape[1:]))
    Dw, Cp = w_neg.shape
    assert Dw == D, f"flattened feature dim {D} != prepared weight rows {Dw}"
    assert num_classes <= Cp

    w_itemsize = jnp.dtype(w_neg.dtype).itemsize
    plan = _plan_tiles(B, D, Cp, w_itemsize)
    TM, TK, TN = plan["tm"], plan["tk"], plan["tn"]
    Bp, Dp = plan["bp"], plan["dp"]

    # Only the (tiny) batch pad is done in the wrapper; x is NOT cast/padded along D
    # on the common path -- the dtype cast happens inside the kernel.
    x2d = x_nchw.reshape(B, D)
    if Bp != B:
        x2d = jnp.pad(x2d, ((0, Bp - B), (0, 0)))
    w = w_neg
    if Dp != D:
        # Rare fallback: huge, non-128-multiple D forced K tiling; pad both operands.
        x2d = jnp.pad(x2d, ((0, 0), (0, Dp - D)))
        w = jnp.pad(w_neg, ((0, Dp - D), (0, 0)))

    grid_i = Bp // TM
    grid_j = Cp // TN

    # Scoped VMEM: derived from the actual tile footprint, generation-aware cap,
    # but never below the footprint (guards against Mosaic VMEM failures).
    need = plan["need"]
    cap = (40 << 20) if plan["small_vmem"] else (100 << 20)
    vmem_limit = min(max(int(need * 1.25), 16 << 20), cap)
    vmem_limit = max(vmem_limit, need + (1 << 20))

    cost = pl.CostEstimate(
        flops=2 * Bp * Dp * Cp,
        transcendentals=0,
        bytes_accessed=(grid_j * Bp * Dp * 4            # x stream (re-read per N tile)
                        + grid_i * Dp * Cp * w_itemsize  # weight re-streamed per batch tile
                        + Bp * Cp * 4                    # output
                        + grid_i * Cp * 4),              # bias
    )

    if not plan["k_tiled"]:
        out_padded = pl.pallas_call(
            _fused_affine_kernel,
            out_shape=jax.ShapeDtypeStruct((Bp, Cp), jnp.float32),
            grid_spec=pltpu.PrefetchScalarGridSpec(
                num_scalar_prefetch=0,
                grid=(grid_i, grid_j),
                in_specs=[
                    pl.BlockSpec((TM, Dp), lambda i, j: (i, 0)),   # x tile (full D)
                    pl.BlockSpec((Dp, TN), lambda i, j: (0, j)),   # frozen weight tile
                    pl.BlockSpec((1, TN), lambda i, j: (0, j)),    # frozen bias row
                ],
                out_specs=pl.BlockSpec((TM, TN), lambda i, j: (i, j)),
            ),
            compiler_params=pltpu.CompilerParams(
                dimension_semantics=("parallel", "parallel"),
                vmem_limit_bytes=vmem_limit,
            ),
            cost_estimate=cost,
        )(x2d, w, b_final)
    else:
        out_padded = pl.pallas_call(
            _fused_affine_ktiled_kernel,
            out_shape=jax.ShapeDtypeStruct((Bp, Cp), jnp.float32),
            grid_spec=pltpu.PrefetchScalarGridSpec(
                num_scalar_prefetch=0,
                grid=(grid_i, grid_j, Dp // TK),
                in_specs=[
                    pl.BlockSpec((TM, TK), lambda i, j, k: (i, k)),
                    pl.BlockSpec((TK, TN), lambda i, j, k: (k, j)),
                    pl.BlockSpec((1, TN), lambda i, j, k: (0, j)),
                ],
                out_specs=pl.BlockSpec((TM, TN), lambda i, j, k: (i, j)),
                scratch_shapes=[pltpu.VMEM((TM, TN), jnp.float32)],
            ),
            compiler_params=pltpu.CompilerParams(
                dimension_semantics=("parallel", "parallel", "arbitrary"),
                vmem_limit_bytes=vmem_limit,
            ),
            cost_estimate=cost,
        )(x2d, w, b_final)

    return out_padded[:B, :num_classes]


# --------------------------------------------------------------------------- #
# Self-test
# --------------------------------------------------------------------------- #
if __name__ == "__main__":
    # Small shapes consistent with the module: batch=2, channels=4, spatial=16, classes=32
    B, Cin, H, W = 2, 4, 16, 16
    num_classes = 32
    D = Cin * H * W

    key = jax.random.PRNGKey(0)
    k_x, k_wfc, k_bfc, k_wlin = jax.random.split(key, 4)

    x = jax.random.normal(k_x, (B, Cin, H, W), dtype=jnp.float32)
    # Deterministic synthetic parameters (base model = flatten -> fc(D, C, bias=True))
    w_fc = jax.random.normal(k_wfc, (num_classes, D), dtype=jnp.float32) * 0.02
    b_fc = jax.random.normal(k_bfc, (num_classes,), dtype=jnp.float32) * 0.02
    w_lin = jax.random.normal(k_wlin, (num_classes, num_classes), dtype=jnp.float32) * 0.1

    # Frozen-param folding + pad + cast done ONCE, outside the per-call path.
    w_neg_bf16, b_final = prepare_frozen_params(w_fc, b_fc, w_lin,
                                                weight_dtype=jnp.bfloat16)
    w_neg_f32, b_final_f32 = prepare_frozen_params(w_fc, b_fc, w_lin,
                                                   weight_dtype=jnp.float32)

    fwd = jax.jit(surrogate_cp_forward, static_argnames=("num_classes",))

    out_bf16 = jax.block_until_ready(fwd(x, w_neg_bf16, b_final,
                                         num_classes=num_classes))
    out_f32 = jax.block_until_ready(fwd(x, w_neg_f32, b_final_f32,
                                        num_classes=num_classes))

    # Pure-JAX reference of the exact (un-fused) forward semantics.
    logits_ref = x.reshape(B, D) @ w_fc.T + b_fc
    ref = 1.0 - logits_ref @ w_lin.T

    assert out_f32.shape == (B, num_classes)
    assert out_bf16.shape == (B, num_classes)
    # f32 path: only associativity differences from the frozen-weight folding.
    assert jnp.allclose(out_f32, ref, atol=1e-4, rtol=1e-4), float(
        jnp.max(jnp.abs(out_f32 - ref)))
    # bf16 frozen-weight path (default for inference): quantization-level tolerance.
    assert jnp.allclose(out_bf16, ref, atol=2e-2, rtol=2e-2), float(
        jnp.max(jnp.abs(out_bf16 - ref)))

    print("KERNEL_OK")
</pallas_src>

<mosaic_0001>
module attributes {stable_mosaic.version = 11 : i64} {
  func.func @_fused_affine_kernel(%arg0: i32, %arg1: i32, %arg2: memref<8x1024xf32, #tpu.memory_space<vmem>>, %arg3: memref<1024x128xbf16, #tpu.memory_space<vmem>>, %arg4: memref<1x128xf32, #tpu.memory_space<vmem>>, %arg5: memref<8x128xf32, #tpu.memory_space<vmem>>) attributes {dimension_semantics = [#tpu.dimension_semantics<parallel>, #tpu.dimension_semantics<parallel>], iteration_bounds = array<i64: 1, 1>, scalar_prefetch = 0 : i64, scratch_operands = 0 : i64, tpu.core_type = #tpu.core_type<tc>, window_params = [{transform_indices = @transform_0, window_bounds = array<i64: 8, 1024>}, {transform_indices = @transform_1, window_bounds = array<i64: 1024, 128>}, {transform_indices = @transform_2, window_bounds = array<i64: 1, 128>}, {transform_indices = @transform_3, window_bounds = array<i64: 8, 128>}]} {
    %c0 = arith.constant 0 : index
    %c0_0 = arith.constant 0 : index
    %0 = vector.load %arg2[%c0, %c0_0] : memref<8x1024xf32, #tpu.memory_space<vmem>>, vector<8x1024xf32>
    %1 = arith.truncf %0 : vector<8x1024xf32> to vector<8x1024xbf16>
    %c0_1 = arith.constant 0 : index
    %c0_2 = arith.constant 0 : index
    %2 = vector.load %arg3[%c0_1, %c0_2] : memref<1024x128xbf16, #tpu.memory_space<vmem>>, vector<1024x128xbf16>
    %cst = arith.constant dense<0.000000e+00> : vector<8x128xf32>
    %3 = tpu.matmul %1, %2, %cst {dimension_numbers = #tpu.dot_dimension_numbers<[1], [0], [0], [1], [0, 0, 1, 1], [], []>} : vector<8x1024xbf16>, vector<1024x128xbf16>, vector<8x128xf32> -> vector<8x128xf32>
    %c0_3 = arith.constant 0 : index
    %c0_4 = arith.constant 0 : index
    %4 = vector.load %arg4[%c0_3, %c0_4] : memref<1x128xf32, #tpu.memory_space<vmem>>, vector<1x128xf32>
    %5 = vector.broadcast %4 : vector<1x128xf32> to vector<8x128xf32>
    %6 = arith.addf %3, %5 : vector<8x128xf32>
    %c0_5 = arith.constant 0 : index
    %c0_6 = arith.constant 0 : index
    %7 = vector.load %arg5[%c0_5, %c0_6] : memref<8x128xf32, #tpu.memory_space<vmem>>, vector<8x128xf32>
    tpu.vector_store %arg5[%c0_5, %c0_6], %6 {strides = array<i32>} : memref<8x128xf32, #tpu.memory_space<vmem>>, vector<8x128xf32>,
    return
  }
  func.func @transform_0(%arg0: i32, %arg1: i32) -> (i32, i32) {
    %c0_i32 = arith.constant 0 : i32
    %c0_i32_0 = arith.constant 0 : i32
    return %arg0, %c0_i32 : i32, i32
  }
  func.func @transform_1(%arg0: i32, %arg1: i32) -> (i32, i32) {
    %c0_i32 = arith.constant 0 : i32
    %c0_i32_0 = arith.constant 0 : i32
    return %c0_i32, %arg1 : i32, i32
  }
  func.func @transform_2(%arg0: i32, %arg1: i32) -> (i32, i32) {
    %c0_i32 = arith.constant 0 : i32
    %c0_i32_0 = arith.constant 0 : i32
    return %c0_i32, %arg1 : i32, i32
  }
  func.func @transform_3(%arg0: i32, %arg1: i32) -> (i32, i32) {
    %c0_i32 = arith.constant 0 : i32
    return %arg0, %arg1 : i32, i32
  }
}

</mosaic_0001>

<bundles_post_ra>
// kernel: surrogate_cp_forward.1
= control target key start
LH: loop header
LB: loop body
LE: loop exit
PB: predicated region body
PF: predicated region fallthrough
CT: control target
= control target key end

     0   :  { %8 = vsyncpa [#allocation3], 0  ;;  %s972_s12 = smov [#allocation2]   ;;  %s1028_s0 = inlined_call_operand.vmem [shape: f32[8,1024], index: 0, kind: input, shape index: {}]   ;;  %s1029_s1 = inlined_call_operand.hbm [shape: bf16[1024,128], index: 1, kind: input, shape index: {}]   ;;  %s1030_s2 = inlined_call_operand.vmem [shape: f32[1,128], index: 2, kind: input, shape index: {}]   ;;  %s1031_s3 = inlined_call_operand.vmem [shape: f32[8,128], index: 3, kind: output, shape index: {}]  }
   0x1   :  { %s16_s13 = sshll.u32 %s972_s12, 4  ;;  %s17_s13 = int_to_ptr.vmem [resolvable:$true] %s16_s13 }
   0x2   :  { %s958_s14 = scalar_lea.vmem %s17_s13, 8192  ;;  %p963_p1 = scmp.lt.s32.totalorder %s17_s13, %s17_s13 }
   0x3   :  { %p959_p0 = scmp.ne.s32.totalorder %s17_s13, %s958_s14  ;;  %p964_p2 = scmp.lt.s32.totalorder %s958_s14, %s958_s14 }
   0x5   :  { %p965_p3 = por %p964_p2, %p963_p1 }
   0x7   :  { %p966_p4 = pnand %p965_p3, %p959_p0 }
   0x9   :  { %969 = shalt.err (!%p966_p4)
}
   0xa   :  { %s973_s15 = smov 64   ;;  %s974_s16 = smov 4  }
   0xb   :  { %22 = dma.hbm_to_vmem [thread:$0]  %s1029_s1, 8192, %s17_s13, [#allocation3], %s973_s15, %s973_s15, %s974_s16  }
   0xc   :  { %970 = dma.done.wait [#allocation3], 8192  }
   0xd   :  { %971 = vsyncadd [#allocation3], 4294959104  ;;  %v886_v0 = vld [vmem:[#allocation2 + $0x78] sm:$0xff]   ;;  %v890_v4 = vld [vmem:[#allocation2 + $0x70] sm:$0xff]  }
   0xe   :  { %v887_v1 = vld [vmem:[#allocation2 + $0xf8] sm:$0xff]   ;;  %795 = vmatprep.subr.bf16.mxu0 %v886_v0  ;;  %v891_v5 = vld [vmem:[#allocation2 + $0xf0] sm:$0xff]   ;;  %v894_v8 = vld [vmem:[#allocation2 + $0x68] sm:$0xff]  }
   0xf   :  { %v888_v2 = vld [vmem:[#allocation2 + $0x38] sm:$0xff]   ;;  %817 = vmatprep.subr.bf16.mxu1 %v887_v1  ;;  %v892_v6 = vld [vmem:[#allocation2 + $0x30] sm:$0xff]   ;;  %v895_v9 = vld [vmem:[#allocation2 + $0xe8] sm:$0xff]  }
  0x10   :  { %v889_v3 = vld [vmem:[#allocation2 + $0xb8] sm:$0xff]   ;;  %796 = vmatpush3.bf16.msra.mxu0 %v888_v2  ;;  %v893_v7 = vld [vmem:[#allocation2 + $0xb0] sm:$0xff]   ;;  %v896_v10 = vld [vmem:[#allocation2 + $0x28] sm:$0xff]  }
  0x11   :  { %818 = vmatpush3.bf16.msra.mxu1 %v889_v3  ;;  %797 = vmatprep.subr.bf16.mxu0 %v890_v4  ;;  %v897_v11 = vld [vmem:[#allocation2 + $0xa8] sm:$0xff]   ;;  %v898_v12 = vld [vmem:[#allocation2 + $0x60] sm:$0xff]   ;;  %v902_v16 = vld [vmem:[#allocation2 + $0x58] sm:$0xff]  }
  0x12   :  { %819 = vmatprep.subr.bf16.mxu1 %v891_v5  ;;  %v899_v13 = vld [vmem:[#allocation2 + $0xe0] sm:$0xff]   ;;  %v903_v17 = vld [vmem:[#allocation2 + $0xd8] sm:$0xff]   ;;  %v906_v20 = vld [vmem:[#allocation2 + $0x50] sm:$0xff]  }
  0x13   :  { %v900_v14 = vld [vmem:[#allocation2 + $0x20] sm:$0xff]   ;;  %v904_v18 = vld [vmem:[#allocation2 + $0x18] sm:$0xff]   ;;  %v907_v21 = vld [vmem:[#allocation2 + $0xd0] sm:$0xff]  }
  0x14   :  { %798 = vmatpush3.bf16.msra.mxu0 %v892_v6  ;;  %v901_v15 = vld [vmem:[#allocation2 + $0xa0] sm:$0xff]   ;;  %v905_v19 = vld [vmem:[#allocation2 + $0x98] sm:$0xff]   ;;  %v908_v22 = vld [vmem:[#allocation2 + $0x10] sm:$0xff]  }
  0x15   :  { %820 = vmatpush3.bf16.msra.mxu1 %v893_v7  ;;  %799 = vmatprep.subr.bf16.mxu0 %v894_v8  ;;  %v909_v23 = vld [vmem:[#allocation2 + $0x90] sm:$0xff]   ;;  %v910_v24 = vld [vmem:[#allocation2 + $0x48] sm:$0xff]   ;;  %v914_v28 = vld [vmem:[#allocation2 + $0x40] sm:$0xff]  }
  0x16   :  { %821 = vmatprep.subr.bf16.mxu1 %v895_v9  ;;  %v911_v25 = vld [vmem:[#allocation2 + $0xc8] sm:$0xff]   ;;  %v915_v29 = vld [vmem:[#allocation2 + $0xc0] sm:$0xff]   ;;  %v32_v33 = vld [vmem:[%s1028_s0 + $0x18] sm:$0xff] }
  0x17   :  { %v912_v26 = vld [vmem:[#allocation2 + $0x8] sm:$0xff]   ;;  %v916_v30 = vld [vmem:[#allocation2] sm:$0xff]   ;;  %v40_v36 = vpack.c.bf16 %v32_v33, %v32_v33  ;;  %v31_v38 = vld [vmem:[%s1028_s0 + $0x10] sm:$0xff] }
  0x18   :  { %800 = vmatpush3.bf16.msra.mxu0 %v896_v10  ;;  %v913_v27 = vld [vmem:[#allocation2 + $0x88] sm:$0xff]   ;;  %v917_v31 = vld [vmem:[#allocation2 + $0x80] sm:$0xff]   ;;  %v39_v39 = vpack.c.bf16 %v31_v38, %v31_v38  ;;  %v918_v40 = vld [vmem:[#allocation2 + $0x178] sm:$0xff]  }
  0x19   :  { %822 = vmatpush3.bf16.msra.mxu1 %v897_v11  ;;  %801 = vmatprep.subr.bf16.mxu0 %v898_v12  ;;  %v30_v32 = vld [vmem:[%s1028_s0 + $0x8] sm:$0xff]  ;;  %v29_v34 = vld [vmem:[%s1028_s0] sm:$0xff]  ;;  %v919_v41 = vld [vmem:[#allocation2 + $0x1f8] sm:$0xff]  }
  0x1a   :  { %823 = vmatprep.subr.bf16.mxu1 %v899_v13  ;;  %v38_v35 = vpack.c.bf16 %v30_v32, %v30_v32  ;;  %v37_v37 = vpack.c.bf16 %v29_v34, %v29_v34  ;;  %636 = vmatprep.mubr.bf16.mxu1 %v40_v36  ;;  %v920_v42 = vld [vmem:[#allocation2 + $0x138] sm:$0xff]   ;;  %v922_v44 = vld [vmem:[#allocation2 + $0x170] sm:$0xff]   ;;  %v926_v48 = vld [vmem:[#allocation2 + $0x168] sm:$0xff]  }
  0x1b   :  { %v921_v43 = vld [vmem:[#allocation2 + $0x1b8] sm:$0xff]   ;;  %v923_v45 = vld [vmem:[#allocation2 + $0x1f0] sm:$0xff]   ;;  %v927_v49 = vld [vmem:[#allocation2 + $0x1e8] sm:$0xff]  }
  0x1c   :  { %802 = vmatpush3.bf16.msra.mxu0 %v900_v14  ;;  %596 = vmatprep.mubr.bf16.mxu0 %v38_v35  ;;  %v924_v46 = vld [vmem:[#allocation2 + $0x130] sm:$0xff]   ;;  %v928_v50 = vld [vmem:[#allocation2 + $0x128] sm:$0xff]   ;;  %v930_v52 = vld [vmem:[#allocation2 + $0x160] sm:$0xff]  }
  0x1d   :  { %824 = vmatpush3.bf16.msra.mxu1 %v901_v15  ;;  %803 = vmatprep.subr.bf16.mxu0 %v902_v16  ;;  %v925_v47 = vld [vmem:[#allocation2 + $0x1b0] sm:$0xff]   ;;  %v929_v51 = vld [vmem:[#allocation2 + $0x1a8] sm:$0xff]   ;;  %v931_v53 = vld [vmem:[#allocation2 + $0x1e0] sm:$0xff]  }
  0x1e   :  { %825 = vmatprep.subr.bf16.mxu1 %v903_v17  ;;  %v932_v54 = vld [vmem:[#allocation2 + $0x120] sm:$0xff]   ;;  %v934_v56 = vld [vmem:[#allocation2 + $0x158] sm:$0xff]   ;;  %v938_v60 = vld [vmem:[#allocation2 + $0x150] sm:$0xff]  }
  0x1f   :  { %v933_v55 = vld [vmem:[#allocation2 + $0x1a0] sm:$0xff]   ;;  %v935_v57 = vld [vmem:[#allocation2 + $0x1d8] sm:$0xff]   ;;  %v939_v61 = vld [vmem:[#allocation2 + $0x1d0] sm:$0xff]  }
  0x20   :  { %804 = vmatpush3.bf16.msra.mxu0 %v904_v18  ;;  %v936_v58 = vld [vmem:[#allocation2 + $0x118] sm:$0xff]   ;;  %v940_v62 = vld [vmem:[#allocation2 + $0x110] sm:$0xff]   ;;  %v942_v0 = vld [vmem:[#allocation2 + $0x148] sm:$0xff]  }
  0x21   :  { %826 = vmatpush3.bf16.msra.mxu1 %v905_v19  ;;  %805 = vmatprep.subr.bf16.mxu0 %v906_v20  ;;  %v937_v59 = vld [vmem:[#allocation2 + $0x198] sm:$0xff]   ;;  %v941_v63 = vld [vmem:[#allocation2 + $0x190] sm:$0xff]   ;;  %v943_v1 = vld [vmem:[#allocation2 + $0x1c8] sm:$0xff]  }
  0x22   :  { %827 = vmatprep.subr.bf16.mxu1 %v907_v21  ;;  %v944_v2 = vld [vmem:[#allocation2 + $0x108] sm:$0xff]   ;;  %v946_v4 = vld [vmem:[#allocation2 + $0x140] sm:$0xff]   ;;  %v36_v9 = vld [vmem:[%s1028_s0 + $0x38] sm:$0xff] }
  0x23   :  { %v945_v3 = vld [vmem:[#allocation2 + $0x188] sm:$0xff]   ;;  %v947_v5 = vld [vmem:[#allocation2 + $0x1c0] sm:$0xff]   ;;  %v44_v11 = vpack.c.bf16 %v36_v9, %v36_v9  ;;  %v35_v13 = vld [vmem:[%s1028_s0 + $0x30] sm:$0xff] }
  0x24   :  { %806 = vmatpush3.bf16.msra.mxu0 %v908_v22  ;;  %v948_v6 = vld [vmem:[#allocation2 + $0x100] sm:$0xff]   ;;  %v34_v8 = vld [vmem:[%s1028_s0 + $0x28] sm:$0xff]  ;;  %v43_v15 = vpack.c.bf16 %v35_v13, %v35_v13 }
  0x25   :  { %828 = vmatpush3.bf16.msra.mxu1 %v909_v23  ;;  %807 = vmatprep.subr.bf16.mxu0 %v910_v24  ;;  %v949_v7 = vld [vmem:[#allocation2 + $0x180] sm:$0xff]   ;;  %v42_v10 = vpack.c.bf16 %v34_v8, %v34_v8 }
  0x26   :  { %829 = vmatprep.subr.bf16.mxu1 %v911_v25  ;;  %v33_v12 = vld [vmem:[%s1028_s0 + $0x20] sm:$0xff] }
  0x27   :  { %v41_v14 = vpack.c.bf16 %v33_v12, %v33_v12  ;;  %v730_v25 = vld [vmem:[%s1030_s2] ss:$0 sm:$0xff] }
  0x28   :  { %808 = vmatpush3.bf16.msra.mxu0 %v912_v26 }
  0x29   :  { %830 = vmatpush3.bf16.msra.mxu1 %v913_v27  ;;  %809 = vmatprep.subr.bf16.mxu0 %v914_v28 }
  0x2a   :  { %831 = vmatprep.subr.bf16.mxu1 %v915_v29 }
  0x2c   :  { %810 = vmatpush3.bf16.msra.mxu0 %v916_v30 }
  0x2d   :  { %832 = vmatpush3.bf16.msra.mxu1 %v917_v31  ;;  %839 = vmatprep.subr.bf16.mxu0 %v918_v40 }
  0x2e   :  { %861 = vmatprep.subr.bf16.mxu1 %v919_v41 }
  0x2f   :  { %597 = vmatmul.mubr.bf16.vlgmr.msra.gmra.mxu0 %v37_v37 }
  0x30   :  { %637 = vmatmul.mubr.bf16.vlgmr.msra.gmra.mxu1 %v39_v39  ;;  %840 = vmatpush3.bf16.msra.mxu0 %v920_v42 }
  0x31   :  { %862 = vmatpush3.bf16.msra.mxu1 %v921_v43  ;;  %841 = vmatprep.subr.bf16.mxu0 %v922_v44 }
  0x32   :  { %863 = vmatprep.subr.bf16.mxu1 %v923_v45  ;;  %676 = vmatprep.mubr.bf16.mxu0 %v42_v10 }
  0x33   :  { %716 = vmatprep.mubr.bf16.mxu1 %v44_v11 }
  0x34   :  { %842 = vmatpush3.bf16.msra.mxu0 %v924_v46 }
  0x35   :  { %864 = vmatpush3.bf16.msra.mxu1 %v925_v47  ;;  %843 = vmatprep.subr.bf16.mxu0 %v926_v48 }
  0x36   :  { %865 = vmatprep.subr.bf16.mxu1 %v927_v49 }
  0x38   :  { %844 = vmatpush3.bf16.msra.mxu0 %v928_v50 }
  0x39   :  { %866 = vmatpush3.bf16.msra.mxu1 %v929_v51  ;;  %845 = vmatprep.subr.bf16.mxu0 %v930_v52 }
  0x3a   :  { %867 = vmatprep.subr.bf16.mxu1 %v931_v53 }
  0x3c   :  { %846 = vmatpush3.bf16.msra.mxu0 %v932_v54 }
  0x3d   :  { %868 = vmatpush3.bf16.msra.mxu1 %v933_v55  ;;  %847 = vmatprep.subr.bf16.mxu0 %v934_v56 }
  0x3e   :  { %869 = vmatprep.subr.bf16.mxu1 %v935_v57 }
  0x40   :  { %848 = vmatpush3.bf16.msra.mxu0 %v936_v58 }
  0x41   :  { %870 = vmatpush3.bf16.msra.mxu1 %v937_v59  ;;  %849 = vmatprep.subr.bf16.mxu0 %v938_v60 }
  0x42   :  { %871 = vmatprep.subr.bf16.mxu1 %v939_v61 }
  0x44   :  { %850 = vmatpush3.bf16.msra.mxu0 %v940_v62 }
  0x45   :  { %872 = vmatpush3.bf16.msra.mxu1 %v941_v63  ;;  %851 = vmatprep.subr.bf16.mxu0 %v942_v0 }
  0x46   :  { %873 = vmatprep.subr.bf16.mxu1 %v943_v1 }
  0x48   :  { %852 = vmatpush3.bf16.msra.mxu0 %v944_v2 }
  0x49   :  { %874 = vmatpush3.bf16.msra.mxu1 %v945_v3  ;;  %853 = vmatprep.subr.bf16.mxu0 %v946_v4 }
  0x4a   :  { %875 = vmatprep.subr.bf16.mxu1 %v947_v5 }
  0x4c   :  { %854 = vmatpush3.bf16.msra.mxu0 %v948_v6 }
  0x4d   :  { %876 = vmatpush3.bf16.msra.mxu1 %v949_v7 }
  0x4f   :  { %677 = vmatmul.mubr.bf16.vlgmr.msra.gmra.mxu0 %v41_v14 }
  0x50   :  { %717 = vmatmul.mubr.bf16.vlgmr.msra.gmra.mxu1 %v43_v15 }
  0xef   :  { %v811_v16 = vpop.f32.mrf.mxu0 }
  0xf0   :  { %v833_v17 = vpop.f32.mrf.mxu1 }
  0xf1   :  { %v812_v18 = vpop.f32.mrf.mxu0 }
  0xf2   :  { %v834_v19 = vpop.f32.mrf.mxu1  ;;  %v813_v24 = vadd.f32 %v812_v18, %v811_v16 }
  0xf3   :  { %v814_v20 = vpop.f32.mrf.mxu0  ;;  %v835_v27 = vadd.f32 %v834_v19, %v833_v17 }
  0xf4   :  { %v836_v21 = vpop.f32.mrf.mxu1  ;;  %v599_v26 = vadd.f32 %v813_v24, %v730_v25 }
  0xf5   :  { %v815_v22 = vpop.f32.mrf.mxu0 }
  0xf6   :  { %v837_v23 = vpop.f32.mrf.mxu1  ;;  %v639_v31 = vadd.f32 %v835_v27, %v599_v26 }
 0x10f   :  { %v855_v28 = vpop.f32.mrf.mxu0 }
 0x110   :  { %v877_v29 = vpop.f32.mrf.mxu1 }
 0x111   :  { %v856_v30 = vpop.f32.mrf.mxu0 }
 0x112   :  { %v857_v32 = vadd.f32 %v856_v30, %v855_v28  ;;  %v878_v33 = vpop.f32.mrf.mxu1 }
 0x113   :  { %v858_v34 = vpop.f32.mrf.mxu0  ;;  %v879_v36 = vadd.f32 %v878_v33, %v877_v29 }
 0x114   :  { %v679_v35 = vadd.f32 %v857_v32, %v639_v31  ;;  %v880_v37 = vpop.f32.mrf.mxu1 }
 0x115   :  { %v859_v38 = vpop.f32.mrf.mxu0 }
 0x116   :  { %v719_v39 = vadd.f32 %v879_v36, %v679_v35  ;;  %v881_v40 = vpop.f32.mrf.mxu1 }
 0x118   :  { %724 = vst [vmem:[%s1031_s3] sm:$0xff] %v719_v39 }
 0x119   :  { %729 = vsyncpa [#allocation3], 1 }

</bundles_post_ra>
